<compile_context>
chip_gen: v7x
topology: tpu7x:2x2x1
jax: 0.10.0
libtpu: 0.0.40
codegen_flags: <defaults>
</compile_context>

<pallas_src>
import numpy as np
import jax
import jax.numpy as jnp
from jax.experimental import pallas as pl
from jax.experimental.pallas import tpu as pltpu


# ----------------------------------------------------------------------------
# Pallas kernel: elementwise mixed-sigmoid activation (the hot path)
# ----------------------------------------------------------------------------
def _activation_kernel(x_ref, b0_ref, b1_ref, o_ref):
    # Compute in f32 regardless of storage dtype (v5e VPU/EUP have no bf16 path).
    x = x_ref[...].astype(jnp.float32)        # (tb, th)
    b0 = b0_ref[...].astype(jnp.float32)      # (1, th) -> broadcasts over batch
    b1 = b1_ref[...].astype(jnp.float32)      # (1, th)
    z = b1 - b0 * x                           # == -beta_0*x + beta_1 (original form)
    y = 1.0 / (1.0 + jnp.exp(z))              # exp + recip hit the EUP slot
    o_ref[...] = y.astype(o_ref.dtype)


# ----------------------------------------------------------------------------
# Tile derivation: largest lane-dense tile under a per-buffer VMEM byte budget.
# ----------------------------------------------------------------------------
def _choose_tiles(B, H, itemsize, bytes_per_buf):
    lane = 128
    sub = {4: 8, 2: 16, 1: 32}.get(itemsize, 8)   # min sublane tile per dtype

    # Hidden tile: full (128-padded) H, capped so even a `sub`-row tile fits budget.
    h_pad128 = ((H + lane - 1) // lane) * lane
    max_lanes = max(lane, (bytes_per_buf // (sub * itemsize) // lane) * lane)
    th = min(h_pad128, max_lanes)

    # Batch tile: fill the remaining budget, multiple of `sub`, capped at padded B.
    max_rows = max(sub, bytes_per_buf // (th * itemsize))
    tb = max(sub, (max_rows // sub) * sub)
    b_pad_sub = ((B + sub - 1) // sub) * sub
    tb = min(tb, b_pad_sub)
    return tb, th


def activation_forward(x, beta_0, beta_1, *, bytes_per_buf=4 * 1024 * 1024):
    """x: (B, H); beta_0/beta_1: (H,). Returns sigmoid(beta_0*x - beta_1)."""
    B, H = x.shape
    dt = x.dtype
    itemsize = jnp.dtype(dt).itemsize
    tb, th = _choose_tiles(B, H, itemsize, bytes_per_buf)

    B_pad = ((B + tb - 1) // tb) * tb
    H_pad = ((H + th - 1) // th) * th

    xp = x
    if (B_pad, H_pad) != (B, H):
        xp = jnp.pad(x, ((0, B_pad - B), (0, H_pad - H)))

    b0 = beta_0.reshape(1, H).astype(dt)      # matches torch .type_as(x)
    b1 = beta_1.reshape(1, H).astype(dt)
    if H_pad != H:
        b0 = jnp.pad(b0, ((0, 0), (0, H_pad - H)))
        b1 = jnp.pad(b1, ((0, 0), (0, H_pad - H)))

    grid = (B_pad // tb, H_pad // th)

    out = pl.pallas_call(
        _activation_kernel,
        out_shape=jax.ShapeDtypeStruct((B_pad, H_pad), dt),
        grid_spec=pltpu.PrefetchScalarGridSpec(
            num_scalar_prefetch=0,
            grid=grid,
            in_specs=[
                pl.BlockSpec((tb, th), lambda i, j: (i, j)),   # x tile
                pl.BlockSpec((1, th), lambda i, j: (0, j)),    # beta_0 (per hidden tile)
                pl.BlockSpec((1, th), lambda i, j: (0, j)),    # beta_1 (per hidden tile)
            ],
            out_specs=pl.BlockSpec((tb, th), lambda i, j: (i, j)),
        ),
        compiler_params=pltpu.CompilerParams(
            # Fully independent output tiles: both axes parallel (v7x 2-TC sharding).
            dimension_semantics=("parallel", "parallel"),
            # Safe on v5e/v6e (128 MiB) and v7x (64 MiB physical); usage ~<20 MiB.
            vmem_limit_bytes=32 * 1024 * 1024,
        ),
    )(xp, b0, b1)

    if (B_pad, H_pad) != (B, H):
        out = out[:B, :H]
    return out


# ----------------------------------------------------------------------------
# Parameter sampling (mirrors Activation.resample) — plain JAX glue
# ----------------------------------------------------------------------------
def resample_betas(key, shape, beta_0_mean, beta_0_var, beta_1_mean, beta_1_var):
    beta_0_std = float(np.sqrt(beta_0_var))
    beta_1_std = float(np.sqrt(beta_1_var))
    k_mix, k0p, k0n, k1p, k1n = jax.random.split(key, 5)
    mix = jax.random.uniform(k_mix, shape) < 0.5
    beta_0 = jnp.where(
        mix,
        jax.random.normal(k0p, shape) * beta_0_std + beta_0_mean,
        jax.random.normal(k0n, shape) * beta_0_std - beta_0_mean,
    )
    beta_1 = jnp.where(
        mix,
        jax.random.normal(k1p, shape) * beta_1_std + beta_1_mean,
        jax.random.normal(k1n, shape) * beta_1_std - beta_1_mean,
    )
    return beta_0.astype(jnp.float32), beta_1.astype(jnp.float32)


class ActivationPallas:
    """JAX/Pallas port of the PyTorch `Activation` module."""

    def __init__(self, shape, do_resample_act_funcs,
                 beta_0_mean, beta_0_var, beta_1_mean, beta_1_var, key):
        self.shape = shape
        self.do_resample_act_funcs = do_resample_act_funcs
        self.beta_0_mean = beta_0_mean
        self.beta_0_var = beta_0_var
        self.beta_1_mean = beta_1_mean
        self.beta_1_var = beta_1_var
        self._key = key
        self.resample()

    def resample(self):
        self._key, sub = jax.random.split(self._key)
        self.beta_0, self.beta_1 = resample_betas(
            sub, self.shape,
            self.beta_0_mean, self.beta_0_var,
            self.beta_1_mean, self.beta_1_var)

    def __call__(self, x):
        if self.do_resample_act_funcs:
            self.resample()
        return activation_forward(x, self.beta_0, self.beta_1)


# ----------------------------------------------------------------------------
if __name__ == "__main__":
    key = jax.random.PRNGKey(0)
    k_params, k_x, k_x2 = jax.random.split(key, 3)

    # Small, lane-aligned case (single-block path).
    batch, hidden = 16, 256
    act = ActivationPallas(
        shape=(hidden,),
        do_resample_act_funcs=False,
        beta_0_mean=1.0, beta_0_var=0.25,
        beta_1_mean=0.5, beta_1_var=0.25,
        key=k_params,
    )
    x = jax.random.normal(k_x, (batch, hidden), dtype=jnp.float32)
    y = jax.block_until_ready(act(x))
    ref = 1.0 / (1.0 + jnp.exp(-act.beta_0[None, :] * x + act.beta_1[None, :]))
    np.testing.assert_allclose(np.asarray(y), np.asarray(ref), rtol=1e-5, atol=1e-5)

    # Ragged case (exercises pad + slice path: non-multiple-of-8 batch, non-128 hidden).
    rb, rh = 13, 200
    b0r = act.beta_0[:rh]
    b1r = act.beta_1[:rh]
    xr = jax.random.normal(k_x2, (rb, rh), dtype=jnp.float32)
    yr = jax.block_until_ready(activation_forward(xr, b0r, b1r))
    refr = 1.0 / (1.0 + jnp.exp(-b0r[None, :] * xr + b1r[None, :]))
    np.testing.assert_allclose(np.asarray(yr), np.asarray(refr), rtol=1e-5, atol=1e-5)

    print("KERNEL_OK")
</pallas_src>

<mosaic_0001>
module attributes {stable_mosaic.version = 11 : i64} {
  func.func @_activation_kernel(%arg0: i32, %arg1: i32, %arg2: memref<16x256xf32, #tpu.memory_space<vmem>>, %arg3: memref<1x256xf32, #tpu.memory_space<vmem>>, %arg4: memref<1x256xf32, #tpu.memory_space<vmem>>, %arg5: memref<16x256xf32, #tpu.memory_space<vmem>>) attributes {dimension_semantics = [#tpu.dimension_semantics<parallel>, #tpu.dimension_semantics<parallel>], iteration_bounds = array<i64: 1, 1>, scalar_prefetch = 0 : i64, scratch_operands = 0 : i64, tpu.core_type = #tpu.core_type<tc>, window_params = [{transform_indices = @transform_0, window_bounds = array<i64: 16, 256>}, {transform_indices = @transform_1, window_bounds = array<i64: 1, 256>}, {transform_indices = @transform_2, window_bounds = array<i64: 1, 256>}, {transform_indices = @transform_3, window_bounds = array<i64: 16, 256>}]} {
    %c0 = arith.constant 0 : index
    %c0_0 = arith.constant 0 : index
    %0 = vector.load %arg2[%c0, %c0_0] : memref<16x256xf32, #tpu.memory_space<vmem>>, vector<16x256xf32>
    %c0_1 = arith.constant 0 : index
    %c0_2 = arith.constant 0 : index
    %1 = vector.load %arg3[%c0_1, %c0_2] : memref<1x256xf32, #tpu.memory_space<vmem>>, vector<1x256xf32>
    %c0_3 = arith.constant 0 : index
    %c0_4 = arith.constant 0 : index
    %2 = vector.load %arg4[%c0_3, %c0_4] : memref<1x256xf32, #tpu.memory_space<vmem>>, vector<1x256xf32>
    %3 = vector.broadcast %1 : vector<1x256xf32> to vector<16x256xf32>
    %4 = arith.mulf %3, %0 : vector<16x256xf32>
    %5 = vector.broadcast %2 : vector<1x256xf32> to vector<16x256xf32>
    %6 = arith.subf %5, %4 : vector<16x256xf32>
    %7 = math.exp %6 : vector<16x256xf32>
    %cst = arith.constant 1.000000e+00 : f32
    %8 = vector.broadcast %cst : f32 to vector<16x256xf32>
    %9 = arith.addf %8, %7 : vector<16x256xf32>
    %cst_5 = arith.constant 1.000000e+00 : f32
    %10 = vector.broadcast %cst_5 : f32 to vector<16x256xf32>
    %11 = arith.divf %10, %9 : vector<16x256xf32>
    %c0_6 = arith.constant 0 : index
    %c0_7 = arith.constant 0 : index
    %12 = vector.load %arg5[%c0_6, %c0_7] : memref<16x256xf32, #tpu.memory_space<vmem>>, vector<16x256xf32>
    tpu.vector_store %arg5[%c0_6, %c0_7], %11 {strides = array<i32>} : memref<16x256xf32, #tpu.memory_space<vmem>>, vector<16x256xf32>,
    return
  }
  func.func @transform_0(%arg0: i32, %arg1: i32) -> (i32, i32) {
    %c0_i32 = arith.constant 0 : i32
    return %arg0, %arg1 : i32, i32
  }
  func.func @transform_1(%arg0: i32, %arg1: i32) -> (i32, i32) {
    %c0_i32 = arith.constant 0 : i32
    %c0_i32_0 = arith.constant 0 : i32
    return %c0_i32, %arg1 : i32, i32
  }
  func.func @transform_2(%arg0: i32, %arg1: i32) -> (i32, i32) {
    %c0_i32 = arith.constant 0 : i32
    %c0_i32_0 = arith.constant 0 : i32
    return %c0_i32, %arg1 : i32, i32
  }
  func.func @transform_3(%arg0: i32, %arg1: i32) -> (i32, i32) {
    %c0_i32 = arith.constant 0 : i32
    return %arg0, %arg1 : i32, i32
  }
}

</mosaic_0001>

<bundles_post_ra>
// kernel: tpu_custom_call.1
= control target key start
LH: loop header
LB: loop body
LE: loop exit
PB: predicated region body
PF: predicated region fallthrough
CT: control target
= control target key end

     0   :  { %8 = vsyncpa [#allocation3], 0  ;;  %s234_s0 = inlined_call_operand.hbm [shape: f32[16,256], index: 0, kind: input, shape index: {}]   ;;  %s235_s1 = inlined_call_operand.vmem [shape: f32[1,256], index: 1, kind: input, shape index: {}]   ;;  %s236_s2 = inlined_call_operand.vmem [shape: f32[1,256], index: 2, kind: input, shape index: {}]   ;;  %s237_s3 = inlined_call_operand.hbm [shape: f32[16,256], index: 3, kind: output, shape index: {}]  }
   0x1   :  { %9 = vsyncpa [#allocation4], 0  ;;  %s174_s12 = smov [#allocation2]   ;;  %s126_s16 = scalar_lea.hbm %s234_s0, 512 }
   0x2   :  { %s15_s13 = sshll.u32 %s174_s12, 4  ;;  %p127_p0 = scmp.ne.s32.totalorder %s234_s0, %s126_s16  ;;  %s16_s13 = int_to_ptr.vmem [resolvable:$true] %s15_s13 }
   0x3   :  { %p130_p1 = scmp.lt.u32.totalorder %s126_s16, %s234_s0 }
   0x5   :  { %p132_p2 = pnand %p130_p1, %p127_p0 }
   0x7   :  { %135 = shalt.err (!%p132_p2)
}
   0x8   :  { %s136_s21 = scalar_lea.vmem %s16_s13, 512  ;;  %p141_p4 = scmp.lt.s32.totalorder %s16_s13, %s16_s13 }
   0x9   :  { %p137_p3 = scmp.ne.s32.totalorder %s16_s13, %s136_s21  ;;  %p142_p5 = scmp.lt.s32.totalorder %s136_s21, %s136_s21 }
   0xb   :  { %p143_p6 = por %p142_p5, %p141_p4 }
   0xd   :  { %p144_p7 = pnand %p143_p6, %p137_p3 }
   0xf   :  { %147 = shalt.err (!%p144_p7)
}
  0x10   :  { %s175_s22 = smov 256   ;;  %s176_s23 = smov 16  }
  0x11   :  { %21 = dma.hbm_to_vmem [thread:$0]  %s234_s0, 512, %s16_s13, [#allocation3], %s175_s22, %s175_s22, %s176_s23  }
  0x12   :  { %170 = dma.done.wait [#allocation3], 512  }
  0x13   :  { %171 = vsyncadd [#allocation3], 4294966784  ;;  %v36_v0 = vlaneseq  ;;  %v29_v4 = vld [vmem:[#allocation2] sm:$0xff]  ;;  %v30_v9 = vld [vmem:[#allocation2 + $0x8] sm:$0xff]  ;;  %s177_s0 = smov [#allocation5]  }
  0x14   :  { %v33_v5 = vld [vmem:[%s235_s1] sm:$0x3]  ;;  %v31_v12 = vld [vmem:[#allocation2 + $0x10] sm:$0xff]  ;;  %v32_v13 = vld [vmem:[#allocation2 + $0x18] sm:$0xff]  ;;  %s94_s1 = sshll.u32 %s177_s0, 4  ;;  %s95_s1 = int_to_ptr.vmem [resolvable:$true] %s94_s1 }
  0x15   :  { %v37_v1 = vshrl.u32 %v36_v0, 7  ;;  %v34_v6 = vld [vmem:[%s236_s2] sm:$0x3]  ;;  %s148_s2 = scalar_lea.vmem %s95_s1, 512  ;;  %p153_p9 = scmp.lt.s32.totalorder %s95_s1, %s95_s1 }
  0x16   :  { %p149_p8 = scmp.ne.s32.totalorder %s95_s1, %s148_s2  ;;  %p154_p10 = scmp.lt.s32.totalorder %s148_s2, %s148_s2 }
  0x17   :  { %v38_v2 = vsub.s32 0, %v37_v1  ;;  %v42_v3 = vsub.s32 1, %v37_v1 }
  0x18   :  { %p155_p11 = por %p154_p10, %p153_p9 }
  0x19   :  { %v39_v7 = vrot.slane %v33_v5, %v38_v2  ;;  %v54_v8 = vrot.slane %v34_v6, %v38_v2  ;;  %v43_v10 = vrot.slane %v33_v5, %v42_v3  ;;  %v58_v11 = vrot.slane %v34_v6, %v42_v3 }
  0x1a   :  { %p156_p12 = pnand %p155_p11, %p149_p8 }
  0x1b   :  { %v46_v14 = vmul.f32 %v39_v7, %v29_v4  ;;  %v47_v15 = vmul.f32 %v43_v10, %v30_v9  ;;  %v48_v16 = vmul.f32 %v39_v7, %v31_v12  ;;  %v49_v17 = vmul.f32 %v43_v10, %v32_v13 }
  0x1d   :  { %v61_v18 = vsub.f32 %v54_v8, %v46_v14  ;;  %v62_v19 = vsub.f32 %v58_v11, %v47_v15  ;;  %v63_v20 = vsub.f32 %v54_v8, %v48_v16  ;;  %v64_v21 = vsub.f32 %v58_v11, %v49_v17 }
  0x1f   :  { %v65_v22 = vmul.f32 1.442695, %v61_v18  ;;  %v67_v23 = vmul.f32 1.442695, %v62_v19  ;;  %v69_v24 = vmul.f32 1.442695, %v63_v20 }
  0x20   :  { %v71_v25 = vmul.f32 1.442695, %v64_v21 }
  0x21   :  { %110 = vpow2.f32 %v65_v22 }
  0x22   :  { %112 = vpow2.f32 %v67_v23 }
  0x23   :  { %114 = vpow2.f32 %v69_v24 }
  0x24   :  { %116 = vpow2.f32 %v71_v25 }
  0x2b   :  { %v111_v26 = vpop.eup %110 }
  0x2c   :  { %v113_v27 = vpop.eup %112  ;;  %v73_v28 = vadd.f32 1.0, %v111_v26 }
  0x2d   :  { %v115_v29 = vpop.eup %114  ;;  %v74_v30 = vadd.f32 1.0, %v113_v27 }
  0x2e   :  { %v117_v31 = vpop.eup %116  ;;  %118 = vrcp.f32 %v73_v28  ;;  %v75_v32 = vadd.f32 1.0, %v115_v29 }
  0x2f   :  { %120 = vrcp.f32 %v74_v30  ;;  %v76_v33 = vadd.f32 1.0, %v117_v31 }
  0x30   :  { %122 = vrcp.f32 %v75_v32 }
  0x31   :  { %124 = vrcp.f32 %v76_v33 }
  0x38   :  { %v119_v34 = vpop.eup %118 }
  0x39   :  { %v121_v35 = vpop.eup %120  ;;  %85 = vst [vmem:[#allocation5] sm:$0xff] %v119_v34 }
  0x3a   :  { %v123_v36 = vpop.eup %122  ;;  %86 = vst [vmem:[#allocation5 + $0x8] sm:$0xff] %v121_v35 }
  0x3b   :  { %v125_v37 = vpop.eup %124  ;;  %87 = vst [vmem:[#allocation5 + $0x10] sm:$0xff] %v123_v36 }
  0x3c   :  { %88 = vst [vmem:[#allocation5 + $0x18] sm:$0xff] %v125_v37 }
  0x3d   :  { %159 = shalt.err (!%p156_p12)
}
  0x3e   :  { %s160_s5 = scalar_lea.hbm %s237_s3, 512 }
  0x3f   :  { %p161_p13 = scmp.ne.s32.totalorder %s237_s3, %s160_s5  ;;  %p164_p0 = scmp.lt.u32.totalorder %s160_s5, %s237_s3 }
  0x41   :  { %p166_p1 = pnand %p164_p0, %p161_p13 }
  0x43   :  { %169 = shalt.err (!%p166_p1)
}
  0x44   :  { %100 = dma.vmem_to_hbm [thread:$0]  %s95_s1, 512, %s237_s3, [#allocation4], %s175_s22, %s175_s22, %s176_s23  }
  0x45   :  { %172 = dma.done.wait [#allocation4], 512  }
  0x46   :  { %173 = vsyncadd [#allocation4], 4294966784 }
  0x47   :  { %104 = vsyncpa [#allocation3], 1 }
  0x48   :  { %105 = vsyncpa [#allocation4], 1 }

</bundles_post_ra>
